<compile_context>
chip_gen: v7x
topology: tpu7x:2x2x1
jax: 0.10.0
libtpu: 0.0.40
codegen_flags: <defaults>
</compile_context>

<pallas_src>
import jax
import jax.numpy as jnp
from jax import lax
from jax.experimental import pallas as pl
from jax.experimental.pallas import tpu as pltpu


def _round_up(x: int, m: int) -> int:
    return ((x + m - 1) // m) * m


def _num_tensorcores_per_chip() -> int:
    """2 TensorCores per chip on v7x, 1 on v5e/v6e (and as a safe default)."""
    try:
        kind = jax.devices()[0].device_kind.lower()
    except Exception:
        return 1
    return 2 if ("v7" in kind or "7x" in kind) else 1


def _mlp_kernel(x_ref, w1t_ref, b1_ref, w2t_ref, b2_ref, w3_ref, b3_ref, o_ref):
    """Fused MLP forward for one batch tile, feature-major compute.

    x_ref  : (TB, D)  input tile in natural batch-major HBM layout
    w1t_ref: (H, D)   W1^T          b1_ref: (H, 1)
    w2t_ref: (H, H)   W2^T          b2_ref: (H, 1)
    w3_ref : (H, 1)                 b3_ref: (1, 1)
    o_ref  : (1, TB)  q-values, batch on the lane axis (lane-dense store)
    """
    x_blk = x_ref[...]                                   # (TB, D)

    # Layer 1: ReLU(W1^T @ x^T + b1) -> (H, TB).  Contract D on both operands
    # (transposed-RHS matmul) so the batch lands on the lane axis without any
    # wrapper-side transpose of x.
    h1 = lax.dot_general(
        w1t_ref[...], x_blk,
        dimension_numbers=(((1,), (1,)), ((), ())),
        preferred_element_type=jnp.float32,
    ) + b1_ref[...]
    h1 = jnp.maximum(h1, 0.0)

    # Layer 2: ReLU(W2^T @ h1 + b2) -> (H, TB)  (MXU, f32 accumulate)
    h2 = jnp.dot(w2t_ref[...], h1, preferred_element_type=jnp.float32) + b2_ref[...]
    h2 = jnp.maximum(h2, 0.0)

    # Layer 3: Linear(H -> 1) as VPU multiply + sublane reduce -> (1, TB)
    out = jnp.sum(h2 * w3_ref[...], axis=0, keepdims=True) + b3_ref[...]
    o_ref[...] = out.astype(o_ref.dtype)


def qltetris_forward(x, params, *, max_tile_b: int = 32768, num_tensorcores=None):
    """Fused MLP forward.  x: (B, D) f32  ->  (B, 1) f32."""
    B, D = x.shape
    H = params["w1"].shape[1]

    x = x.astype(jnp.float32)
    w1t = params["w1"].T.astype(jnp.float32)              # (H, D)
    w2t = params["w2"].T.astype(jnp.float32)              # (H, H)
    b1 = params["b1"].reshape(H, 1).astype(jnp.float32)   # (H, 1)
    b2 = params["b2"].reshape(H, 1).astype(jnp.float32)   # (H, 1)
    w3 = params["w3"].reshape(H, 1).astype(jnp.float32)   # (H, 1)
    b3 = params["b3"].reshape(1, 1).astype(jnp.float32)   # (1, 1)

    if num_tensorcores is None:
        num_tensorcores = _num_tensorcores_per_chip()

    # One tile per TensorCore; tile width is a multiple of 128 lanes and capped
    # so the working set (~300 B/column) stays well inside scoped VMEM on v7x.
    bp_min = _round_up(B, 128)
    tb = min(_round_up(pl.cdiv(bp_min, num_tensorcores), 128), max_tile_b)
    num_tiles = pl.cdiv(bp_min, tb)
    bp = num_tiles * tb

    n_param = int(w1t.size + w2t.size + b1.size + b2.size + w3.size + b3.size)
    cost = pl.CostEstimate(
        flops=2 * B * (D * H + H * H + H),
        transcendentals=0,
        bytes_accessed=4 * (B * D + B + n_param),
    )

    out_row = pl.pallas_call(
        _mlp_kernel,
        out_shape=jax.ShapeDtypeStruct((1, bp), jnp.float32),
        grid=(num_tiles,),
        in_specs=[
            # x tile in natural layout; last (ragged) block is edge-masked by
            # Pallas -- tail columns are independent and discarded below.
            pl.BlockSpec((tb, D), lambda i: (i, 0)),
            # Params: constant block index -> fetched once, VMEM-resident,
            # whole-buffer (aligned) loads in the kernel.
            pl.BlockSpec((H, D), lambda i: (0, 0)),
            pl.BlockSpec((H, 1), lambda i: (0, 0)),
            pl.BlockSpec((H, H), lambda i: (0, 0)),
            pl.BlockSpec((H, 1), lambda i: (0, 0)),
            pl.BlockSpec((H, 1), lambda i: (0, 0)),
            pl.BlockSpec((1, 1), lambda i: (0, 0)),
        ],
        out_specs=pl.BlockSpec((1, tb), lambda i: (0, i)),
        compiler_params=pltpu.CompilerParams(
            dimension_semantics=("parallel",),   # shards the 2 tiles across TCs on v7x
        ),
        cost_estimate=cost,
    )(x, w1t, b1, w2t, b2, w3, b3)

    return out_row[0, :B].reshape(B, 1)


def init_params(key, d_in=4, hidden=32):
    """Deterministic parameter init (PyTorch-style uniform fan-in scaling)."""
    ks = jax.random.split(key, 6)

    def lin(kw, kb, fan_in, fan_out):
        bound = 1.0 / jnp.sqrt(jnp.float32(fan_in))
        w = jax.random.uniform(kw, (fan_in, fan_out), jnp.float32, -bound, bound)
        b = jax.random.uniform(kb, (1, fan_out), jnp.float32, -bound, bound)
        return w, b

    w1, b1 = lin(ks[0], ks[1], d_in, hidden)
    w2, b2 = lin(ks[2], ks[3], hidden, hidden)
    w3, b3 = lin(ks[4], ks[5], hidden, 1)
    return {"w1": w1, "b1": b1, "w2": w2, "b2": b2, "w3": w3, "b3": b3}


def reference_forward(x, p):
    h1 = jnp.maximum(x @ p["w1"] + p["b1"], 0.0)
    h2 = jnp.maximum(h1 @ p["w2"] + p["b2"], 0.0)
    return h2 @ p["w3"] + p["b3"]


# TODO(synk): bestMoveFinder / trainModel (env stepping, replay buffer, Adam
# update loop) are host-side control flow and are intentionally not kernelized.

if __name__ == "__main__":
    key = jax.random.PRNGKey(0)
    k_x, k_p = jax.random.split(key)

    # Tetris Q-network shapes: 4 board features -> 32 -> 32 -> 1.
    # Small batch of candidate board states; B=300 exercises lane padding and a
    # ragged last input block (and 2 balanced tiles on v7x).
    batch, d_in, hidden = 300, 4, 32
    x = jax.random.normal(k_x, (batch, d_in), dtype=jnp.float32)
    params = init_params(k_p, d_in=d_in, hidden=hidden)

    out = qltetris_forward(x, params)
    out = jax.block_until_ready(out)

    ref = reference_forward(x, params)
    assert out.shape == (batch, 1), out.shape
    # Tolerance covers MXU default-precision f32 matmul differences vs XLA.
    assert jnp.allclose(out, ref, atol=5e-3, rtol=5e-3), (
        float(jnp.max(jnp.abs(out - ref))))
    print("KERNEL_OK")
</pallas_src>

<mosaic_0001>
module attributes {stable_mosaic.version = 11 : i64} {
  func.func @_mlp_kernel(%arg0: i32, %arg1: memref<384x4xf32, #tpu.memory_space<vmem>>, %arg2: memref<32x4xf32, #tpu.memory_space<vmem>>, %arg3: memref<32x1xf32, #tpu.memory_space<vmem>>, %arg4: memref<32x32xf32, #tpu.memory_space<vmem>>, %arg5: memref<32x1xf32, #tpu.memory_space<vmem>>, %arg6: memref<32x1xf32, #tpu.memory_space<vmem>>, %arg7: memref<1x1xf32, #tpu.memory_space<vmem>>, %arg8: memref<1x384xf32, #tpu.memory_space<vmem>>) attributes {dimension_semantics = [#tpu.dimension_semantics<parallel>], iteration_bounds = array<i64: 1>, scalar_prefetch = 0 : i64, scratch_operands = 0 : i64, tpu.core_type = #tpu.core_type<tc>, window_params = [{transform_indices = @transform_0, window_bounds = array<i64: 384, 4>}, {pipeline_mode = #tpu.pipeline_mode<synchronous>, transform_indices = @transform_1, window_bounds = array<i64: 32, 4>}, {pipeline_mode = #tpu.pipeline_mode<synchronous>, transform_indices = @transform_2, window_bounds = array<i64: 32, 1>}, {pipeline_mode = #tpu.pipeline_mode<synchronous>, transform_indices = @transform_3, window_bounds = array<i64: 32, 32>}, {pipeline_mode = #tpu.pipeline_mode<synchronous>, transform_indices = @transform_4, window_bounds = array<i64: 32, 1>}, {pipeline_mode = #tpu.pipeline_mode<synchronous>, transform_indices = @transform_5, window_bounds = array<i64: 32, 1>}, {pipeline_mode = #tpu.pipeline_mode<synchronous>, transform_indices = @transform_6, window_bounds = array<i64: 1, 1>}, {transform_indices = @transform_7, window_bounds = array<i64: 1, 384>}]} {
    %c0 = arith.constant 0 : index
    %c0_0 = arith.constant 0 : index
    %0 = vector.load %arg1[%c0, %c0_0] : memref<384x4xf32, #tpu.memory_space<vmem>>, vector<384x4xf32>
    %c0_1 = arith.constant 0 : index
    %c0_2 = arith.constant 0 : index
    %1 = vector.load %arg2[%c0_1, %c0_2] : memref<32x4xf32, #tpu.memory_space<vmem>>, vector<32x4xf32>
    %cst = arith.constant dense<0.000000e+00> : vector<32x384xf32>
    %2 = tpu.matmul %1, %0, %cst {dimension_numbers = #tpu.dot_dimension_numbers<[1], [1], [0], [0], [0, 0, 1, 0], [], []>} : vector<32x4xf32>, vector<384x4xf32>, vector<32x384xf32> -> vector<32x384xf32>
    %c0_3 = arith.constant 0 : index
    %c0_4 = arith.constant 0 : index
    %3 = vector.load %arg3[%c0_3, %c0_4] : memref<32x1xf32, #tpu.memory_space<vmem>>, vector<32x1xf32>
    %4 = vector.broadcast %3 : vector<32x1xf32> to vector<32x384xf32>
    %5 = arith.addf %2, %4 : vector<32x384xf32>
    %cst_5 = arith.constant 0.000000e+00 : f32
    %6 = vector.broadcast %cst_5 : f32 to vector<32x384xf32>
    %7 = arith.maximumf %5, %6 : vector<32x384xf32>
    %c0_6 = arith.constant 0 : index
    %c0_7 = arith.constant 0 : index
    %8 = vector.load %arg4[%c0_6, %c0_7] : memref<32x32xf32, #tpu.memory_space<vmem>>, vector<32x32xf32>
    %cst_8 = arith.constant dense<0.000000e+00> : vector<32x384xf32>
    %9 = tpu.matmul %8, %7, %cst_8 {dimension_numbers = #tpu.dot_dimension_numbers<[1], [0], [0], [1], [0, 0, 1, 1], [], []>} : vector<32x32xf32>, vector<32x384xf32>, vector<32x384xf32> -> vector<32x384xf32>
    %c0_9 = arith.constant 0 : index
    %c0_10 = arith.constant 0 : index
    %10 = vector.load %arg5[%c0_9, %c0_10] : memref<32x1xf32, #tpu.memory_space<vmem>>, vector<32x1xf32>
    %11 = vector.broadcast %10 : vector<32x1xf32> to vector<32x384xf32>
    %12 = arith.addf %9, %11 : vector<32x384xf32>
    %cst_11 = arith.constant 0.000000e+00 : f32
    %13 = vector.broadcast %cst_11 : f32 to vector<32x384xf32>
    %14 = arith.maximumf %12, %13 : vector<32x384xf32>
    %c0_12 = arith.constant 0 : index
    %c0_13 = arith.constant 0 : index
    %15 = vector.load %arg6[%c0_12, %c0_13] : memref<32x1xf32, #tpu.memory_space<vmem>>, vector<32x1xf32>
    %16 = vector.broadcast %15 : vector<32x1xf32> to vector<32x384xf32>
    %17 = arith.mulf %14, %16 : vector<32x384xf32>
    %cst_14 = arith.constant dense<0.000000e+00> : vector<384xf32>
    %18 = vector.multi_reduction <add>, %17, %cst_14 [0] : vector<32x384xf32> to vector<384xf32>
    %19 = vector.shape_cast %18 : vector<384xf32> to vector<1x384xf32>
    %c0_15 = arith.constant 0 : index
    %c0_16 = arith.constant 0 : index
    %20 = vector.load %arg7[%c0_15, %c0_16] : memref<1x1xf32, #tpu.memory_space<vmem>>, vector<1x1xf32>
    %21 = vector.broadcast %20 : vector<1x1xf32> to vector<1x384xf32>
    %22 = arith.addf %19, %21 : vector<1x384xf32>
    %c0_17 = arith.constant 0 : index
    %c0_18 = arith.constant 0 : index
    %23 = vector.load %arg8[%c0_17, %c0_18] : memref<1x384xf32, #tpu.memory_space<vmem>>, vector<1x384xf32>
    tpu.vector_store %arg8[%c0_17, %c0_18], %22 {strides = array<i32>} : memref<1x384xf32, #tpu.memory_space<vmem>>, vector<1x384xf32>,
    return
  }
  func.func @transform_0(%arg0: i32) -> (i32, i32) {
    %c0_i32 = arith.constant 0 : i32
    %c0_i32_0 = arith.constant 0 : i32
    return %arg0, %c0_i32 : i32, i32
  }
  func.func @transform_1(%arg0: i32) -> (i32, i32) {
    %c0_i32 = arith.constant 0 : i32
    %c0_i32_0 = arith.constant 0 : i32
    %c0_i32_1 = arith.constant 0 : i32
    return %c0_i32, %c0_i32_0 : i32, i32
  }
  func.func @transform_2(%arg0: i32) -> (i32, i32) {
    %c0_i32 = arith.constant 0 : i32
    %c0_i32_0 = arith.constant 0 : i32
    %c0_i32_1 = arith.constant 0 : i32
    return %c0_i32, %c0_i32_0 : i32, i32
  }
  func.func @transform_3(%arg0: i32) -> (i32, i32) {
    %c0_i32 = arith.constant 0 : i32
    %c0_i32_0 = arith.constant 0 : i32
    %c0_i32_1 = arith.constant 0 : i32
    return %c0_i32, %c0_i32_0 : i32, i32
  }
  func.func @transform_4(%arg0: i32) -> (i32, i32) {
    %c0_i32 = arith.constant 0 : i32
    %c0_i32_0 = arith.constant 0 : i32
    %c0_i32_1 = arith.constant 0 : i32
    return %c0_i32, %c0_i32_0 : i32, i32
  }
  func.func @transform_5(%arg0: i32) -> (i32, i32) {
    %c0_i32 = arith.constant 0 : i32
    %c0_i32_0 = arith.constant 0 : i32
    %c0_i32_1 = arith.constant 0 : i32
    return %c0_i32, %c0_i32_0 : i32, i32
  }
  func.func @transform_6(%arg0: i32) -> (i32, i32) {
    %c0_i32 = arith.constant 0 : i32
    %c0_i32_0 = arith.constant 0 : i32
    %c0_i32_1 = arith.constant 0 : i32
    return %c0_i32, %c0_i32_0 : i32, i32
  }
  func.func @transform_7(%arg0: i32) -> (i32, i32) {
    %c0_i32 = arith.constant 0 : i32
    %c0_i32_0 = arith.constant 0 : i32
    return %c0_i32, %arg0 : i32, i32
  }
}

</mosaic_0001>

<bundles_post_ra>
// kernel: tpu_custom_call.1
= control target key start
LH: loop header
LB: loop body
LE: loop exit
PB: predicated region body
PF: predicated region fallthrough
CT: control target
= control target key end

     0   :  { %s1489_s0 = inlined_call_operand.vmem [shape: f32[300,4], index: 0, kind: input, shape index: {}]   ;;  %s1490_s1 = inlined_call_operand.vmem [shape: f32[32,4], index: 1, kind: input, shape index: {}]   ;;  %s1491_s2 = inlined_call_operand.vmem [shape: f32[32,1], index: 2, kind: input, shape index: {}]   ;;  %s1492_s3 = inlined_call_operand.vmem [shape: f32[32,32], index: 3, kind: input, shape index: {}]   ;;  %s1493_s4 = inlined_call_operand.vmem [shape: f32[32,1], index: 4, kind: input, shape index: {}]   ;;  %s1494_s5 = inlined_call_operand.vmem [shape: f32[32,1], index: 5, kind: input, shape index: {}]   ;;  %s1495_s6 = inlined_call_operand.<no memory space> [shape: f32[1,1], index: 6, kind: input, shape index: {}]   ;;  %s1496_s7 = inlined_call_operand.hbm [shape: f32[1,384], index: 7, kind: output, shape index: {}]  }
   0x1   :  { %v12_v0 = vstv %s1495_s6 }
   0x2   :  { %13 = vst [vmem:[#allocation2] sm:$0x1] %v12_v0 }
   0x3   :  { %v45_v1 = vld [vmem:[%s1489_s0 + $0x80] sm:$0xff]  ;;  %v46_v2 = vld [vmem:[%s1489_s0 + $0x88] sm:$0xff]  ;;  %vm105_vm0 = vcmask 31744   ;;  %v1123_v8 = vmov 0   ;;  %v47_v11 = vld [vmem:[%s1489_s0 + $0x90] sm:$0xff] }
   0x4   :  { %v61_v3 = vld [vmem:[%s1489_s0 + $0x100] sm:$0xff]  ;;  %v981_v4 = vpack.c.bf16 %v46_v2, %v45_v1  ;;  %vm1181_vm1 = vmpackc.low %vm105_vm0, %vm105_vm0  ;;  %v62_v6 = vld [vmem:[%s1489_s0 + $0x108] sm:$0xff]  ;;  %1097 = vset.pattern.permute.xlu0 %v1123_v8  ;;  %1098 = vset.pattern.permute.xlu1 %v1123_v8 }
   0x5   :  { %v29_v7 = vld [vmem:[%s1489_s0] sm:$0xff]  ;;  %v1029_v9 = vpack.c.bf16 %v62_v6, %v61_v3  ;;  %v30_v10 = vld [vmem:[%s1489_s0 + $0x8] sm:$0xff]  ;;  %v48_v12 = vld [vmem:[%s1489_s0 + $0x98] sm:$0xff] }
   0x6   :  { %983 = vmatprep.subr.msk.bf16.mxu0 %vm1181_vm1, %v981_v4  ;;  %v984_v13 = vpack.c.bf16 %v30_v10, %v29_v7  ;;  %v987_v14 = vpack.c.bf16 %v48_v12, %v47_v11  ;;  %v63_v15 = vld [vmem:[%s1489_s0 + $0x110] sm:$0xff]  ;;  %v64_v16 = vld [vmem:[%s1489_s0 + $0x118] sm:$0xff]  ;;  %v49_v20 = vld [vmem:[%s1489_s0 + $0xa0] sm:$0xff] }
   0x7   :  { %1031 = vmatprep.subr.msk.bf16.mxu1 %vm1181_vm1, %v1029_v9  ;;  %v1035_v17 = vpack.c.bf16 %v64_v16, %v63_v15  ;;  %v31_v18 = vld [vmem:[%s1489_s0 + $0x10] sm:$0xff]  ;;  %v32_v19 = vld [vmem:[%s1489_s0 + $0x18] sm:$0xff]  ;;  %v50_v21 = vld [vmem:[%s1489_s0 + $0xa8] sm:$0xff] }
   0x8   :  { %986 = vmatpush3.bf16.xpose.msk.msra.mxu0 %vm1181_vm1, %v984_v13  ;;  %1034 = vmatpush3.bf16.xpose.msk.msra.mxu1 %vm1181_vm1, %v1029_v9  ;;  %v65_v22 = vld [vmem:[%s1489_s0 + $0x120] sm:$0xff]  ;;  %v66_v23 = vld [vmem:[%s1489_s0 + $0x128] sm:$0xff]  ;;  %v990_v24 = vpack.c.bf16 %v32_v19, %v31_v18  ;;  %v993_v25 = vpack.c.bf16 %v50_v21, %v49_v20  ;;  %v51_v29 = vld [vmem:[%s1489_s0 + $0xb0] sm:$0xff] }
   0x9   :  { %989 = vmatprep.subr.msk.bf16.mxu0 %vm1181_vm1, %v987_v14  ;;  %1037 = vmatprep.subr.msk.bf16.mxu1 %vm1181_vm1, %v1035_v17  ;;  %v1041_v26 = vpack.c.bf16 %v66_v23, %v65_v22  ;;  %v33_v27 = vld [vmem:[%s1489_s0 + $0x20] sm:$0xff]  ;;  %v34_v28 = vld [vmem:[%s1489_s0 + $0x28] sm:$0xff]  ;;  %v52_v30 = vld [vmem:[%s1489_s0 + $0xb8] sm:$0xff] }
   0xa   :  { %v67_v31 = vld [vmem:[%s1489_s0 + $0x130] sm:$0xff]  ;;  %v68_v32 = vld [vmem:[%s1489_s0 + $0x138] sm:$0xff]  ;;  %v1265_v33 = vld [vmem:[%s1490_s1] sm:$0xff]  ;;  %v996_v34 = vpack.c.bf16 %v34_v28, %v33_v27  ;;  %v999_v36 = vpack.c.bf16 %v52_v30, %v51_v29 }
   0xb   :  { %893 = vmatprep.mubr.msk.f32.mxu0 %vm105_vm0, %v1265_v33  ;;  %961 = vmatprep.mubr.msk.f32.mxu1 %vm105_vm0, %v1265_v33  ;;  %v81_v35 = vld [vmem:[%s1491_s2] sm:$0xff]  ;;  %v1047_v37 = vpack.c.bf16 %v68_v32, %v67_v31  ;;  %v83_v38 = vld [vmem:[%s1491_s2 + $0x10] sm:$0xff]  ;;  %v82_v39 = vld [vmem:[%s1491_s2 + $0x8] sm:$0xff] }
   0xc   :  { %87 = vperm.xlu0 %1097, %v81_v35   ;;  %97 = vperm.xlu1 %1098, %v83_v38   ;;  %v84_v40 = vld [vmem:[%s1491_s2 + $0x18] sm:$0xff]  ;;  %v35_v41 = vld [vmem:[%s1489_s0 + $0x30] sm:$0xff]  ;;  %v53_v43 = vld [vmem:[%s1489_s0 + $0xc0] sm:$0xff] }
   0xd   :  { %v36_v42 = vld [vmem:[%s1489_s0 + $0x38] sm:$0xff] }
  0x10   :  { %992 = vmatpush3.bf16.xpose.msk.msra.mxu0 %vm1181_vm1, %v990_v24  ;;  %1040 = vmatpush3.bf16.xpose.msk.msra.mxu1 %vm1181_vm1, %v1035_v17 }
  0x11   :  { %995 = vmatprep.subr.msk.bf16.mxu0 %vm1181_vm1, %v993_v25  ;;  %1043 = vmatprep.subr.msk.bf16.mxu1 %vm1181_vm1, %v1041_v26 }
  0x18   :  { %998 = vmatpush3.bf16.xpose.msk.msra.mxu0 %vm1181_vm1, %v996_v34  ;;  %1046 = vmatpush3.bf16.xpose.msk.msra.mxu1 %vm1181_vm1, %v1041_v26 }
  0x19   :  { %1001 = vmatprep.subr.msk.bf16.mxu0 %vm1181_vm1, %v999_v36  ;;  %1049 = vmatprep.subr.msk.bf16.mxu1 %vm1181_vm1, %v1047_v37 }
  0x1a   :  { %14 = vsyncpa [#allocation4], 0  ;;  %v54_v44 = vld [vmem:[%s1489_s0 + $0xc8] sm:$0xff]  ;;  %v69_v45 = vld [vmem:[%s1489_s0 + $0x140] sm:$0xff]  ;;  %92 = vperm.xlu0 %1097, %v82_v39   ;;  %102 = vperm.xlu1 %1098, %v84_v40   ;;  %v1002_v49 = vpack.c.bf16 %v36_v42, %v35_v41  ;;  %vm476_vm2 = vcmask 261120   ;;  %v1124_v29 = vmov 0.0  }
  0x1b   :  { %v70_v46 = vld [vmem:[%s1489_s0 + $0x148] sm:$0xff]  ;;  %v452_v47 = vld [vmem:[%s1493_s4] sm:$0xff]  ;;  %v1005_v50 = vpack.c.bf16 %v54_v44, %v53_v43  ;;  %v454_v52 = vld [vmem:[%s1493_s4 + $0x10] sm:$0xff] }
  0x1c   :  { %v453_v48 = vld [vmem:[%s1493_s4 + $0x8] sm:$0xff]  ;;  %v1053_v51 = vpack.c.bf16 %v70_v46, %v69_v45  ;;  %v455_v53 = vld [vmem:[%s1493_s4 + $0x18] sm:$0xff]  ;;  %v37_v54 = vld [vmem:[%s1489_s0 + $0x40] sm:$0xff] }
  0x1d   :  { %v38_v55 = vld [vmem:[%s1489_s0 + $0x48] sm:$0xff]  ;;  %v55_v56 = vld [vmem:[%s1489_s0 + $0xd0] sm:$0xff]  ;;  %v56_v57 = vld [vmem:[%s1489_s0 + $0xd8] sm:$0xff] }
  0x1e   :  { %458 = vperm.xlu0 %1097, %v452_v47   ;;  %463 = vperm.xlu1 %1098, %v453_v48   ;;  %v71_v58 = vld [vmem:[%s1489_s0 + $0x150] sm:$0xff]  ;;  %v72_v59 = vld [vmem:[%s1489_s0 + $0x158] sm:$0xff]  ;;  %v675_v60 = vld [vmem:[%s1494_s5] sm:$0xff]  ;;  %v1008_v62 = vpack.c.bf16 %v38_v55, %v37_v54  ;;  %v1011_v63 = vpack.c.bf16 %v56_v57, %v55_v56 }
  0x1f   :  { %v676_v61 = vld [vmem:[%s1494_s5 + $0x8] sm:$0xff]  ;;  %v1059_v0 = vpack.c.bf16 %v72_v59, %v71_v58  ;;  %v677_v1 = vld [vmem:[%s1494_s5 + $0x10] sm:$0xff]  ;;  %v678_v2 = vld [vmem:[%s1494_s5 + $0x18] sm:$0xff] }
  0x20   :  { %1004 = vmatpush3.bf16.xpose.msk.msra.mxu0 %vm1181_vm1, %v1002_v49  ;;  %1052 = vmatpush3.bf16.xpose.msk.msra.mxu1 %vm1181_vm1, %v1047_v37  ;;  %v39_v3 = vld [vmem:[%s1489_s0 + $0x50] sm:$0xff]  ;;  %v40_v4 = vld [vmem:[%s1489_s0 + $0x58] sm:$0xff]  ;;  %v57_v6 = vld [vmem:[%s1489_s0 + $0xe0] sm:$0xff] }
  0x21   :  { %1007 = vmatprep.subr.msk.bf16.mxu0 %vm1181_vm1, %v1005_v50  ;;  %1055 = vmatprep.subr.msk.bf16.mxu1 %vm1181_vm1, %v1053_v51  ;;  %v58_v7 = vld [vmem:[%s1489_s0 + $0xe8] sm:$0xff]  ;;  %v73_v8 = vld [vmem:[%s1489_s0 + $0x160] sm:$0xff]  ;;  %v1014_v11 = vpack.c.bf16 %v40_v4, %v39_v3  ;;  %v59_v16 = vld [vmem:[%s1489_s0 + $0xf0] sm:$0xff] }
  0x22   :  { %468 = vperm.xlu0 %1097, %v454_v52   ;;  %473 = vperm.xlu1 %1098, %v455_v53   ;;  %v74_v9 = vld [vmem:[%s1489_s0 + $0x168] sm:$0xff]  ;;  %v738_v10 = vld [vmem:[#allocation2] sm:$0x1]  ;;  %v1017_v12 = vpack.c.bf16 %v58_v7, %v57_v6  ;;  %v60_v17 = vld [vmem:[%s1489_s0 + $0xf8] sm:$0xff] }
  0x23   :  { %v1065_v13 = vpack.c.bf16 %v74_v9, %v73_v8  ;;  %v41_v14 = vld [vmem:[%s1489_s0 + $0x60] sm:$0xff]  ;;  %v42_v15 = vld [vmem:[%s1489_s0 + $0x68] sm:$0xff]  ;;  %v75_v18 = vld [vmem:[%s1489_s0 + $0x170] sm:$0xff]  ;;  %v1023_v21 = vpack.c.bf16 %v60_v17, %v59_v16 }
  0x24   :  { %v76_v19 = vld [vmem:[%s1489_s0 + $0x178] sm:$0xff]  ;;  %v1020_v20 = vpack.c.bf16 %v42_v15, %v41_v14  ;;  %v43_v23 = vld [vmem:[%s1489_s0 + $0x70] sm:$0xff]  ;;  %v78_v26 = vld [vmem:[%s1490_s1 + $0x8] sm:$0xff] }
  0x25   :  { %v1071_v22 = vpack.c.bf16 %v76_v19, %v75_v18  ;;  %v44_v24 = vld [vmem:[%s1489_s0 + $0x78] sm:$0xff]  ;;  %v79_v27 = vld [vmem:[%s1490_s1 + $0x10] sm:$0xff]  ;;  %v1452_v28 = vld [vmem:[%s1492_s3] sm:$0xff] }
  0x26   :  { %681 = vperm.xlu0 %1097, %v675_v60   ;;  %686 = vperm.xlu1 %1098, %v676_v61   ;;  %v1026_v25 = vpack.c.bf16 %v44_v24, %v43_v23  ;;  %v80_v5 = vld [vmem:[%s1490_s1 + $0x18] sm:$0xff]  ;;  %v449_v6 = vld [vmem:[%s1492_s3 + $0x8] sm:$0xff]  ;;  %v450_v8 = vld [vmem:[%s1492_s3 + $0x10] sm:$0xff] }
  0x27   :  { %v451_v14 = vld [vmem:[%s1492_s3 + $0x18] sm:$0xff]  ;;  %s1126_s3 = smov [#allocation3]  }
  0x28   :  { %1010 = vmatpush3.bf16.xpose.msk.msra.mxu0 %vm1181_vm1, %v1008_v62  ;;  %1058 = vmatpush3.bf16.xpose.msk.msra.mxu1 %vm1181_vm1, %v1053_v51  ;;  %s789_s6 = sshll.u32 %s1126_s3, 4  ;;  %s790_s6 = int_to_ptr.vmem [resolvable:$true] %s789_s6 }
  0x29   :  { %1013 = vmatprep.subr.msk.bf16.mxu0 %vm1181_vm1, %v1011_v63  ;;  %1061 = vmatprep.subr.msk.bf16.mxu1 %vm1181_vm1, %v1059_v0  ;;  %s1099_s9 = scalar_lea.vmem %s790_s6, 48  ;;  %s1103_s10 = scalar_lea.vmem %s790_s6, 64 }
  0x2a   :  { %691 = vperm.xlu0 %1097, %v677_v1   ;;  %696 = vperm.xlu1 %1098, %v678_v2   ;;  %p1100_p0 = scmp.ne.s32.totalorder %s790_s6, %s1099_s9  ;;  %p1104_p1 = scmp.lt.s32.totalorder %s790_s6, %s790_s6 }
  0x2b   :  { %p1105_p2 = scmp.lt.s32.totalorder %s1103_s10, %s1099_s9 }
  0x2d   :  { %p1106_p3 = por %p1105_p2, %p1104_p1 }
  0x2e   :  { %741 = vperm.xlu0 %1097, %v738_v10  }
  0x2f   :  { %p1107_p4 = pnand %p1106_p3, %p1100_p0 }
  0x30   :  { %1016 = vmatpush3.bf16.xpose.msk.msra.mxu0 %vm1181_vm1, %v1014_v11  ;;  %1064 = vmatpush3.bf16.xpose.msk.msra.mxu1 %vm1181_vm1, %v1059_v0 }
  0x31   :  { %1019 = vmatprep.subr.msk.bf16.mxu0 %vm1181_vm1, %v1017_v12  ;;  %1067 = vmatprep.subr.msk.bf16.mxu1 %vm1181_vm1, %v1065_v13 }
  0x38   :  { %1022 = vmatpush3.bf16.xpose.msk.msra.mxu0 %vm1181_vm1, %v1020_v20  ;;  %1070 = vmatpush3.bf16.xpose.msk.msra.mxu1 %vm1181_vm1, %v1065_v13 }
  0x39   :  { %1025 = vmatprep.subr.msk.bf16.mxu0 %vm1181_vm1, %v1023_v21  ;;  %1073 = vmatprep.subr.msk.bf16.mxu1 %vm1181_vm1, %v1071_v22 }
  0x40   :  { %1028 = vmatpush3.bf16.xpose.msk.msra.mxu0 %vm1181_vm1, %v1026_v25  ;;  %1076 = vmatpush3.bf16.xpose.msk.msra.mxu1 %vm1181_vm1, %v1071_v22 }
  0x47   :  { %894 = vmatmul.mubr.msk.f32.vlgmr.msra.gmra.mrb[0].mxu0 %vm105_vm0, %v1265_v33  ;;  %962 = vmatmul.mubr.msk.f32.vlgmr.msra.gmra.mrb[0].mxu1 %vm105_vm0, %v78_v26 }
  0x48   :  { %895 = vmatprep.mubr.msk.f32.mxu0 %vm105_vm0, %v78_v26  ;;  %964 = vmatprep.mubr.msk.f32.mxu1 %vm105_vm0, %v79_v27 }
  0x4b   :  { %896 = vmatmul.mubr.msk.f32.gmra.mrb[2].mxu0 %vm105_vm0, %v78_v26  ;;  %965 = vmatmul.mubr.msk.f32.gmra.mrb[2].mxu1 %vm105_vm0, %v80_v5 }
  0x4c   :  { %897 = vmatprep.mubr.msk.f32.mxu0 %vm105_vm0, %v79_v27  ;;  %553 = vmatprep.mubr.f32.mxu1 %v1124_v29 }
  0x4f   :  { %898 = vmatmul.mubr.msk.f32.gmra.mrb[4].mxu0 %vm105_vm0, %v79_v27 }
  0x50   :  { %899 = vmatprep.mubr.msk.f32.mxu0 %vm105_vm0, %v80_v5 }
  0x53   :  { %900 = vmatmul.mubr.msk.f32.gmra.mrb[6].mxu0 %vm105_vm0, %v80_v5 }
  0x54   :  { %975 = vmatprep.mubr.msk.f32.mxu0 %vm476_vm2, %v1452_v28 }
  0x8b   :  { %v88_v30 = vpop.permute.xlu0 %87  ;;  %v98_v31 = vpop.permute.xlu1 %97 }
  0x99   :  { %v93_v32 = vpop.permute.xlu0 %92  ;;  %v103_v39 = vpop.permute.xlu1 %102 }
  0x9d   :  { %v459_v16 = vpop.permute.xlu0 %458  ;;  %v464_v17 = vpop.permute.xlu1 %463 }
  0xa1   :  { %v469_v18 = vpop.permute.xlu0 %468  ;;  %v474_v19 = vpop.permute.xlu1 %473 }
  0xa5   :  { %v682_v24 = vpop.permute.xlu0 %681  ;;  %v687_v26 = vpop.permute.xlu1 %686 }
 0x11a   :  { %v328_v33 = vpop.f32.mrb[0].mxu0  ;;  %v963_v34 = vpop.f32.mrb[0].mxu1 }
 0x11b   :  { %v423_v35 = vadd.f32 %v963_v34, %v93_v32  ;;  %v330_v36 = vpop.f32.mrb[1].mxu0  ;;  %v417_v37 = vpop.f32.mrb[1].mxu1  ;;  %v329_v40 = vadd.f32 %v328_v33, %v88_v30 }
 0x11c   :  { %v418_v38 = vadd.f32 %v417_v37, %v88_v30  ;;  %v331_v42 = vadd.f32 %v330_v36, %v88_v30  ;;  %v692_v37 = vpop.permute.xlu0 %691 }
 0x11d   :  { %v441_v41 = vmax.f32 %v423_v35, 0.0  ;;  %v436_v53 = vmax.f32 %v329_v40, 0.0 }
 0x11e   :  { %v438_v43 = vmax.f32 %v418_v38, 0.0  ;;  %v334_v44 = vpop.f32.mrb[2].mxu0  ;;  %v966_v45 = vpop.f32.mrb[2].mxu1  ;;  %v437_v56 = vmax.f32 %v331_v42, 0.0 }
 0x11f   :  { %v335_v46 = vadd.f32 %v334_v44, %v93_v32  ;;  %v433_v47 = vadd.f32 %v966_v45, %v103_v39  ;;  %v336_v48 = vpop.f32.mrb[3].mxu0  ;;  %v427_v49 = vpop.f32.mrb[3].mxu1 }
 0x120   :  { %v1085_v50 = vpack.c.bf16 %v441_v41, %v438_v43  ;;  %v337_v51 = vadd.f32 %v336_v48, %v93_v32  ;;  %v428_v52 = vadd.f32 %v427_v49, %v98_v31  ;;  %v697_v42 = vpop.permute.xlu1 %696 }
 0x121   :  { %v439_v54 = vmax.f32 %v335_v46, 0.0  ;;  %v447_v55 = vmax.f32 %v433_v47, 0.0 }
 0x122   :  { %v440_v57 = vmax.f32 %v337_v51, 0.0  ;;  %v444_v58 = vmax.f32 %v428_v52, 0.0  ;;  %v340_v59 = vpop.f32.mrb[4].mxu0  ;;  %1086 = vmatprep.subr.bf16.mxu0 %v1085_v50 }
 0x123   :  { %v1079_v60 = vpack.c.bf16 %v439_v54, %v436_v53  ;;  %v342_v61 = vpop.f32.mrb[5].mxu0  ;;  %1088 = vmatpush3.bf16.msra.mxu0 %v1085_v50  ;;  %v341_v0 = vadd.f32 %v340_v59, %v98_v31 }
 0x124   :  { %v1077_v62 = vpack.c.bf16 %v440_v57, %v437_v56  ;;  %v1089_v63 = vpack.c.bf16 %v447_v55, %v444_v58  ;;  %v343_v1 = vadd.f32 %v342_v61, %v98_v31 }
 0x125   :  { %v442_v9 = vmax.f32 %v341_v0, 0.0 }
 0x126   :  { %v346_v2 = vpop.f32.mrb[6].mxu0  ;;  %1078 = vmatprep.subr.bf16.mxu1 %v1077_v62  ;;  %1090 = vmatprep.subr.bf16.mxu0 %v1089_v63  ;;  %v443_v11 = vmax.f32 %v343_v1, 0.0 }
 0x127   :  { %v347_v3 = vadd.f32 %v346_v2, %v103_v39  ;;  %v348_v4 = vpop.f32.mrb[7].mxu0  ;;  %1080 = vmatpush1.bf16.msra.mxu1 %v1079_v60  ;;  %1092 = vmatpush3.bf16.msra.mxu0 %v1089_v63 }
 0x128   :  { %v349_v7 = vadd.f32 %v348_v4, %v103_v39 }
 0x129   :  { %v445_v10 = vmax.f32 %v347_v3, 0.0 }
 0x12a   :  { %v446_v12 = vmax.f32 %v349_v7, 0.0  ;;  %976 = vmatmul.mubr.msk.f32.vlgmr.msra.gmra.mrb[8].mxu0 %vm476_vm2, %v449_v6 }
 0x12b   :  { %v1083_v13 = vpack.c.bf16 %v445_v10, %v442_v9  ;;  %978 = vmatprep.mubr.msk.f32.mxu0 %vm476_vm2, %v450_v8 }
 0x12c   :  { %v1081_v15 = vpack.c.bf16 %v446_v12, %v443_v11 }
 0x12e   :  { %1082 = vmatprep.subr.bf16.mxu1 %v1081_v15  ;;  %979 = vmatmul.mubr.msk.f32.gmra.mrb[10].mxu0 %vm476_vm2, %v451_v14 }
 0x12f   :  { %1084 = vmatpush1.bf16.msra.mxu1 %v1083_v13 }
 0x132   :  { %853 = vmatmul.mubr.msk.f32.vlgmr.msra.gmra.mrb[4].mxu1 %vm476_vm2, %v1452_v28 }
 0x133   :  { %559 = vmatprep.mubr.f32.mxu1 %v1124_v29 }
 0x136   :  { %854 = vmatmul.mubr.msk.f32.gmra.mrb[6].mxu1 %vm476_vm2, %v449_v6 }
 0x137   :  { %565 = vmatprep.mubr.f32.mxu1 %v1124_v29 }
 0x13a   :  { %855 = vmatmul.mubr.msk.f32.gmra.mrb[8].mxu1 %vm476_vm2, %v450_v8 }
 0x13b   :  { %571 = vmatprep.mubr.f32.mxu1 %v1124_v29 }
 0x13e   :  { %856 = vmatmul.mubr.msk.f32.gmra.mrb[10].mxu1 %vm476_vm2, %v451_v14 }
 0x1fd   :  { %v977_v20 = vpop.f32.mrb[8].mxu0 }
 0x1fe   :  { %v650_v21 = vadd.f32 %v977_v20, %v464_v17  ;;  %v644_v22 = vpop.f32.mrb[9].mxu0  ;;  %v744_v20 = vlaneseq }
 0x1ff   :  { %v645_v23 = vadd.f32 %v644_v22, %v459_v16 }
 0x200   :  { %v668_v25 = vmax.f32 %v650_v21, 0.0  ;;  %vm780_vm3 = vcmp.lt.s32.totalorder %v744_v20, 384 }
 0x201   :  { %v665_v27 = vmax.f32 %v645_v23, 0.0  ;;  %v980_v5 = vpop.f32.mrb[10].mxu0 }
 0x202   :  { %v704_v28 = vmul.f32 %v687_v26, %v668_v25  ;;  %v660_v30 = vadd.f32 %v980_v5, %v474_v19  ;;  %v654_v31 = vpop.f32.mrb[11].mxu0  ;;  %v745_v25 = vshrl.u32 %v744_v20, 7 }
 0x203   :  { %v701_v32 = vmul.f32 %v682_v24, %v665_v27  ;;  %v655_v29 = vadd.f32 %v654_v31, %v469_v18 }
 0x204   :  { %v674_v34 = vmax.f32 %v660_v30, 0.0 }
 0x205   :  { %v729_v33 = vadd.f32 %v704_v28, %v701_v32  ;;  %v671_v35 = vmax.f32 %v655_v29, 0.0  ;;  %v555_v36 = vpop.f32.mrb[4].mxu1  ;;  %v1125_v28 = vmov 1966171168   ;;  %v746_v32 = vsub.s32 0, %v745_v25 }
 0x206   :  { %v556_v38 = vadd.f32 %v555_v36, %v459_v16  ;;  %v557_v39 = vpop.f32.mrb[5].mxu1  ;;  %v710_v43 = vmul.f32 %v697_v42, %v674_v34  ;;  %v756_v30 = vunpack.c.l.s4 %v1125_v28 }
 0x207   :  { %v707_v40 = vmul.f32 %v692_v37, %v671_v35  ;;  %v558_v41 = vadd.f32 %v557_v39, %v459_v16 }
 0x208   :  { %v663_v46 = vmax.f32 %v556_v38, 0.0  ;;  %v757_v36 = vunpack.c.0.s8 %v756_v30 }
 0x209   :  { %v730_v44 = vadd.f32 %v729_v33, %v707_v40  ;;  %v561_v45 = vpop.f32.mrb[6].mxu1  ;;  %v664_v50 = vmax.f32 %v558_v41, 0.0  ;;  %v742_v33 = vpop.permute.xlu0 %741 }
 0x20a   :  { %v562_v47 = vadd.f32 %v561_v45, %v464_v17  ;;  %v563_v48 = vpop.f32.mrb[7].mxu1  ;;  %v699_v55 = vmul.f32 %v682_v24, %v663_v46  ;;  %v747_v39 = vrot.slane %v742_v33, %v746_v32 }
 0x20b   :  { %v731_v49 = vadd.f32 %v730_v44, %v710_v43  ;;  %v564_v51 = vadd.f32 %v563_v48, %v464_v17  ;;  %v700_v60 = vmul.f32 %v682_v24, %v664_v50  ;;  %v760_v43 = vsub.s32 %v757_v36, %v745_v25 }
 0x20c   :  { %v666_v52 = vmax.f32 %v562_v47, 0.0 }
 0x20d   :  { %v667_v53 = vmax.f32 %v564_v51, 0.0  ;;  %v567_v54 = vpop.f32.mrb[8].mxu1  ;;  %v732_v59 = vrot.slane %v731_v49, 4 }
 0x20e   :  { %v702_v56 = vmul.f32 %v687_v26, %v666_v52  ;;  %v568_v57 = vadd.f32 %v567_v54, %v469_v18  ;;  %v569_v58 = vpop.f32.mrb[9].mxu1 }
 0x20f   :  { %v703_v61 = vmul.f32 %v687_v26, %v667_v53  ;;  %v570_v62 = vadd.f32 %v569_v58, %v469_v18  ;;  %v733_v8 = vadd.f32 %v732_v59, %v731_v49 }
 0x210   :  { %v711_v63 = vadd.f32 %v702_v56, %v699_v55  ;;  %v669_v0 = vmax.f32 %v568_v57, 0.0 }
 0x211   :  { %v720_v1 = vadd.f32 %v703_v61, %v700_v60  ;;  %v670_v2 = vmax.f32 %v570_v62, 0.0  ;;  %v573_v3 = vpop.f32.mrb[10].mxu1  ;;  %v734_v16 = vrot.slane %v733_v8, 2 }
 0x212   :  { %v705_v4 = vmul.f32 %v692_v37, %v669_v0  ;;  %v574_v6 = vadd.f32 %v573_v3, %v474_v19  ;;  %v575_v7 = vpop.f32.mrb[11].mxu1 }
 0x213   :  { %v706_v9 = vmul.f32 %v692_v37, %v670_v2  ;;  %v576_v10 = vadd.f32 %v575_v7, %v474_v19  ;;  %v735_v23 = vadd.f32 %v734_v16, %v733_v8 }
 0x214   :  { %v712_v11 = vadd.f32 %v711_v63, %v705_v4  ;;  %v672_v12 = vmax.f32 %v574_v6, 0.0 }
 0x215   :  { %v721_v13 = vadd.f32 %v720_v1, %v706_v9  ;;  %v673_v14 = vmax.f32 %v576_v10, 0.0  ;;  %v736_v19 = vrot.slane %v735_v23, 1 }
 0x216   :  { %v708_v15 = vmul.f32 %v697_v42, %v672_v12 }
 0x217   :  { %v709_v17 = vmul.f32 %v697_v42, %v673_v14  ;;  %v737_v38 = vadd.f32 %v736_v19, %v735_v23 }
 0x218   :  { %v713_v18 = vadd.f32 %v712_v11, %v708_v15 }
 0x219   :  { %v722_v21 = vadd.f32 %v721_v13, %v709_v17  ;;  %v750_v45 = vadd.f32 %v747_v39, %v737_v38 }
 0x21a   :  { %v714_v22 = vrot.slane %v713_v18, 4 }
 0x21b   :  { %v723_v24 = vrot.slane %v722_v21, 4  ;;  %v768_v48 = vrot.slane %v750_v45, %v760_v43 }
 0x21c   :  { %v715_v26 = vadd.f32 %v714_v22, %v713_v18 }
 0x21d   :  { %v724_v27 = vadd.f32 %v723_v24, %v722_v21 }
 0x21e   :  { %v716_v5 = vrot.slane %v715_v26, 2 }
 0x21f   :  { %v725_v31 = vrot.slane %v724_v27, 2 }
 0x220   :  { %v717_v29 = vadd.f32 %v716_v5, %v715_v26 }
 0x221   :  { %v726_v34 = vadd.f32 %v725_v31, %v724_v27 }
 0x222   :  { %v718_v35 = vrot.slane %v717_v29, 1 }
 0x223   :  { %v727_v37 = vrot.slane %v726_v34, 1 }
 0x224   :  { %v719_v40 = vadd.f32 %v718_v35, %v717_v29 }
 0x225   :  { %v728_v41 = vadd.f32 %v727_v37, %v726_v34 }
 0x226   :  { %v748_v42 = vadd.f32 %v747_v39, %v719_v40 }
 0x227   :  { %v749_v44 = vadd.f32 %v747_v39, %v728_v41 }
 0x229   :  { %v754_v46 = vcombine.low %v748_v42, %v749_v44 }
 0x22b   :  { %v761_v47 = vrot.slane %v754_v46, %v760_v43 }
 0x22d   :  { %v769_v49 = vcombine.low %v761_v47, %v768_v48 }
 0x22f   :  { %v776_v50 = vrot.slane %v769_v49, %v760_v43 }
 0x231   :  { %782 = vst.msk [vmem:[#allocation3] sm:$0x7] %vm780_vm3, %v776_v50 }
 0x232   :  { %1110 = shalt.err (!%p1107_p4)
}
 0x233   :  { %s1111_s12 = scalar_lea.hbm %s1496_s7, 48 }
 0x234   :  { %p1112_p5 = scmp.ne.s32.totalorder %s1496_s7, %s1111_s12  ;;  %p1115_p6 = scmp.lt.u32.totalorder %s1111_s12, %s1496_s7 }
 0x236   :  { %p1117_p7 = pnand %p1115_p6, %p1112_p5 }
 0x238   :  { %1120 = shalt.err (!%p1117_p7)
}
 0x239   :  { %792 = dma.vmem_to_hbm [thread:$0]  %s790_s6, 48, %s1496_s7, [#allocation4]  }
 0x23a   :  { %1121 = dma.done.wait [#allocation4], 48  }
 0x23b   :  { %1122 = vsyncadd [#allocation4], 4294967248 }
 0x23c   :  { %796 = vsyncpa [#allocation4], 1 }

</bundles_post_ra>
